<compile_context>
chip_gen: v7x
topology: tpu7x:2x2x1
jax: 0.10.0
libtpu: 0.0.40
codegen_flags: <defaults>
</compile_context>

<pallas_src>
import functools
import math

import jax
import jax.numpy as jnp
import numpy as np
from jax.experimental import pallas as pl
from jax.experimental.pallas import tpu as pltpu


def _vmem_limit_bytes():
    """Per-generation scoped-VMEM limit (v7x has only 64 MiB physical)."""
    try:
        kind = jax.devices()[0].device_kind.lower()
    except Exception:
        kind = ""
    if "v5" in kind or "v6" in kind:
        return 100 * 1024 * 1024   # 128 MiB physical parts
    return 48 * 1024 * 1024        # v7x (64 MiB physical) and unknown parts


# ----------------------- Kernel A: fused per-node projection -----------------------
# One MXU call per row tile produces h, f1 and f2 for every head (the wrapper packs
# [W_all | W@v0 per head | W@v1 per head] into a single (c_in, P) weight), and the
# results are emitted directly in the layouts Kernel B wants.
def _proj_kernel(x_ref, w_ref, b_ref, h_ref, f1_ref, f2_ref, *, n_heads, c_head):
    x = x_ref[...].astype(jnp.float32)                                  # (tile_n, c_in)
    proj = (jnp.dot(x, w_ref[...], preferred_element_type=jnp.float32)
            + b_ref[...])                                               # (tile_n, P)
    hc = n_heads * c_head
    for hd in range(n_heads):                                           # static unroll
        h_ref[hd] = proj[:, hd * c_head:(hd + 1) * c_head].astype(h_ref.dtype)
        f1_ref[hd] = proj[:, hc + hd:hc + hd + 1]                       # (tile_n, 1)
    f2_ref[...] = proj[:, hc + n_heads:hc + 2 * n_heads]                # (tile_n, H)


# -------------- Kernel B: masked-sigmoid attention + aggregation (key-tiled) --------------
def _gat_attn_kernel(adj_ref, f1_ref, f2t_ref, h_ref, out_ref, acc_ref, den_ref, *,
                     n_heads, c_head, hc_pad, inv_temp, compute_dtype):
    k = pl.program_id(1)
    nk = pl.num_programs(1)

    @pl.when(k == 0)
    def _():
        acc_ref[...] = jnp.zeros_like(acc_ref)
        den_ref[...] = jnp.zeros_like(den_ref)

    adj = adj_ref[...]                                   # (tile_n, tile_k), streamed dtype
    mask = adj != 0
    adj_c = adj.astype(compute_dtype)
    f1 = f1_ref[...].astype(compute_dtype)               # (H, tile_n, 1)
    f2t = f2t_ref[...].astype(compute_dtype)             # (H, 1, tile_k)

    for hd in range(n_heads):                            # static unroll over heads
        logits = adj_c * (f1[hd] + f2t[hd])              # (tile_n, tile_k)
        # "sparse softmax" over the adjacency support.  The reference's "-0.5"
        # is a constant factor exp(-0.5/temp) on every supported edge and
        # cancels exactly in the row normalization, so it is dropped here.
        s = jax.nn.sigmoid(logits)
        if inv_temp != 1.0:
            s = s * inv_temp
        p = jnp.exp(s)
        p = jnp.where(mask, p, jnp.zeros_like(p))
        den_ref[hd] += jnp.sum(p, axis=1, keepdims=True, dtype=jnp.float32)
        acc_ref[hd] += jnp.dot(p, h_ref[hd].astype(compute_dtype),
                               preferred_element_type=jnp.float32)

    @pl.when(k == nk - 1)
    def _():
        pieces = []
        for hd in range(n_heads):
            den = den_ref[hd]                                            # (tile_n, 1)
            inv = jnp.where(den > 0.0, pl.reciprocal(den, approx=True),
                            jnp.zeros_like(den))
            pieces.append(acc_ref[hd] * inv)                             # (tile_n, c_head)
        pad = hc_pad - n_heads * c_head
        if pad:
            pieces.append(jnp.zeros((pieces[0].shape[0], pad), jnp.float32))
        # single lane-dense store of all heads (padded to a 128-lane multiple)
        out_ref[...] = jnp.concatenate(pieces, axis=1).astype(out_ref.dtype)


def gat_multi_head_forward(node_feats, adj_matrix, params, *, n_heads,
                           concat_heads=True, temp=1.0,
                           tile_n=256, tile_k=512,
                           compute_dtype=jnp.bfloat16, adj_dtype=jnp.bfloat16):
    """Pallas implementation of GATMultiHead.forward.

    params: dict with lists (length n_heads) of
      "W":  (c_in, c_head)   -- already transposed vs. PyTorch's (c_out, c_in)
      "b":  (c_head,)
      "v0": (c_head, 1)
      "v1": (c_head, 1)
    compute_dtype: dtype used for sigmoid/exp and the attn@h MXU matmul
                   (bf16 default; f32 accumulation either way).
    adj_dtype:     dtype adj is streamed in (bf16 is exact for 0/1 adjacency).
    """
    N, c_in = node_feats.shape
    H = n_heads
    c_head = params["W"][0].shape[1]
    Hc = H * c_head
    P = Hc + 2 * H

    # ---- Fused projection weight: one MXU call yields h, f1, f2 for every head ----
    W_all = jnp.concatenate(params["W"], axis=1)                                  # (c_in, H*c)
    b_all = jnp.concatenate(params["b"], axis=0)                                  # (H*c,)
    Wf1 = jnp.concatenate([params["W"][h] @ params["v0"][h] for h in range(H)], axis=1)
    Wf2 = jnp.concatenate([params["W"][h] @ params["v1"][h] for h in range(H)], axis=1)
    bf1 = jnp.concatenate([params["b"][h] @ params["v0"][h] for h in range(H)], axis=0)
    bf2 = jnp.concatenate([params["b"][h] @ params["v1"][h] for h in range(H)], axis=0)
    W_comb = jnp.concatenate([W_all, Wf1, Wf2], axis=1).astype(jnp.float32)       # (c_in, P)
    b_comb = jnp.concatenate([b_all, bf1, bf2], axis=0).reshape(1, P).astype(jnp.float32)

    # ---- Tile sizes: shrink to the graph for tiny N (powers of two keep lcm small) ----
    tile_n = int(min(tile_n, max(16, pl.next_power_of_2(N))))
    tile_k = int(min(tile_k, max(128, pl.next_power_of_2(N))))
    lcm = math.lcm(tile_n, tile_k)
    Np = ((N + lcm - 1) // lcm) * lcm          # padded N, multiple of both tile sizes

    x = node_feats.astype(jnp.float32)
    adj = adj_matrix
    if Np != N:
        x = jnp.pad(x, ((0, Np - N), (0, 0)))
        adj = jnp.pad(adj, ((0, Np - N), (0, Np - N)))
    adj = adj.astype(adj_dtype)                # dominant HBM stream -> half-width reads

    vmem_limit = _vmem_limit_bytes()

    # ---- Kernel A: fused projection ----
    h_all, f1, f2 = pl.pallas_call(
        functools.partial(_proj_kernel, n_heads=H, c_head=c_head),
        out_shape=(
            jax.ShapeDtypeStruct((H, Np, c_head), compute_dtype),   # h, head-major
            jax.ShapeDtypeStruct((H, Np, 1), jnp.float32),          # f1, head-major
            jax.ShapeDtypeStruct((Np, H), jnp.float32),             # f2 (transposed below)
        ),
        grid_spec=pltpu.PrefetchScalarGridSpec(
            num_scalar_prefetch=0,
            grid=(Np // tile_n,),
            in_specs=[
                pl.BlockSpec((tile_n, c_in), lambda i: (i, 0)),     # node_feats row tile
                pl.BlockSpec((c_in, P), lambda i: (0, 0)),          # fused weight (resident)
                pl.BlockSpec((1, P), lambda i: (0, 0)),             # fused bias (resident)
            ],
            out_specs=(
                pl.BlockSpec((H, tile_n, c_head), lambda i: (0, i, 0)),
                pl.BlockSpec((H, tile_n, 1), lambda i: (0, i, 0)),
                pl.BlockSpec((tile_n, H), lambda i: (i, 0)),
            ),
        ),
        compiler_params=pltpu.CompilerParams(
            dimension_semantics=("parallel",),
            vmem_limit_bytes=vmem_limit),
    )(x, W_comb, b_comb)

    # f2^T: tiny (N*H floats) XLA transpose between the two kernels.
    f2t = f2.T[:, None, :]                     # (H, 1, Np)

    # ---- Kernel B: key-tiled attention + aggregation with online accumulation ----
    hc_pad = max(128, -(-Hc // 128) * 128)     # lane-dense output slab
    attn_kernel = functools.partial(
        _gat_attn_kernel, n_heads=H, c_head=c_head, hc_pad=hc_pad,
        inv_temp=1.0 / float(temp), compute_dtype=compute_dtype)

    out = pl.pallas_call(
        attn_kernel,
        out_shape=jax.ShapeDtypeStruct((Np, hc_pad), jnp.float32),
        grid_spec=pltpu.PrefetchScalarGridSpec(
            num_scalar_prefetch=0,
            grid=(Np // tile_n, Np // tile_k),
            in_specs=[
                pl.BlockSpec((tile_n, tile_k), lambda i, k: (i, k)),       # adj tile (dominant)
                pl.BlockSpec((H, tile_n, 1), lambda i, k: (0, i, 0)),      # f1 rows
                pl.BlockSpec((H, 1, tile_k), lambda i, k: (0, 0, k)),      # f2^T keys
                pl.BlockSpec((H, tile_k, c_head), lambda i, k: (0, k, 0)), # h keys
            ],
            out_specs=pl.BlockSpec((tile_n, hc_pad), lambda i, k: (i, 0)),
            scratch_shapes=[
                pltpu.VMEM((H, tile_n, c_head), jnp.float32),   # numerator accumulator
                pltpu.VMEM((H, tile_n, 1), jnp.float32),        # denominator accumulator
            ],
        ),
        compiler_params=pltpu.CompilerParams(
            dimension_semantics=("parallel", "arbitrary"),
            vmem_limit_bytes=vmem_limit),
    )(adj, f1, f2t, h_all)

    out = out[:N, :Hc]
    if not concat_heads:
        out = out.reshape(N, H, c_head).mean(axis=1)
    return out


# ----------------------------- plain-JAX reference -----------------------------
def _reference_forward(node_feats, adj, params, *, n_heads, concat_heads, temp):
    outs = []
    for hd in range(n_heads):
        W, b = params["W"][hd], params["b"][hd]
        v0, v1 = params["v0"][hd], params["v1"][hd]
        h = node_feats @ W + b
        f1 = h @ v0                                   # (N, 1)
        f2 = h @ v1                                   # (N, 1)
        logits = adj * (f1 + f2.T)
        u = jax.nn.sigmoid(logits) - 0.5
        mask = adj != 0
        p = jnp.where(mask, jnp.exp(u / temp), 0.0)
        denom = p.sum(axis=1, keepdims=True)
        attn = jnp.where(denom > 0, p / denom, 0.0)   # empty rows stay zero (to_dense())
        outs.append(attn @ h)
    if concat_heads:
        return jnp.concatenate(outs, axis=1)
    return jnp.mean(jnp.stack(outs, axis=0), axis=0)


if __name__ == "__main__":
    # Small shapes consistent with the module; N is deliberately NOT a multiple
    # of the tile sizes so the ragged-tail padding path is exercised.
    N = 200
    c_in = 32
    c_out = 32
    n_heads = 2
    concat_heads = True
    temp = 1.0
    c_head = c_out // n_heads if concat_heads else c_out

    key = jax.random.PRNGKey(0)
    keys = jax.random.split(key, 4 * n_heads + 2)

    lim_w = float(np.sqrt(6.0 / (c_in + c_head)))
    lim_v = float(np.sqrt(6.0 / (c_head + 1)))
    # PyTorch zero-inits the linear bias; small random values here so the fused
    # bias path in the kernel produces non-trivial numbers to check.
    params = {"W": [], "b": [], "v0": [], "v1": []}
    for hd in range(n_heads):
        params["W"].append(jax.random.uniform(
            keys[4 * hd + 0], (c_in, c_head), jnp.float32, -lim_w, lim_w))
        params["b"].append(0.1 * jax.random.normal(
            keys[4 * hd + 1], (c_head,), jnp.float32))
        params["v0"].append(jax.random.uniform(
            keys[4 * hd + 2], (c_head, 1), jnp.float32, -lim_v, lim_v))
        params["v1"].append(jax.random.uniform(
            keys[4 * hd + 3], (c_head, 1), jnp.float32, -lim_v, lim_v))

    node_feats = jax.random.normal(keys[-2], (N, c_in), jnp.float32)

    # Sparse-ish symmetric adjacency with self-loops (every row has support).
    a = jax.random.uniform(keys[-1], (N, N), jnp.float32)
    adj = (a < 0.05).astype(jnp.float32)
    adj = jnp.maximum(adj, adj.T)
    adj = jnp.maximum(adj, jnp.eye(N, dtype=jnp.float32))

    ref = _reference_forward(node_feats, adj, params, n_heads=n_heads,
                             concat_heads=concat_heads, temp=temp)

    # Exact path (f32 streaming + f32 compute): tight check.  Tolerance covers
    # pl.reciprocal(approx=True) and the fused-bias accumulation-order change.
    out_f32 = gat_multi_head_forward(
        node_feats, adj, params, n_heads=n_heads, concat_heads=concat_heads,
        temp=temp, compute_dtype=jnp.float32, adj_dtype=jnp.float32)
    out_f32 = jax.block_until_ready(out_f32)
    np.testing.assert_allclose(np.asarray(out_f32), np.asarray(ref), rtol=2e-3, atol=2e-3)

    # Fast path (default: bf16 adj streaming, bf16 sigmoid/exp, bf16 MXU aggregation).
    out_fast = gat_multi_head_forward(
        node_feats, adj, params, n_heads=n_heads, concat_heads=concat_heads, temp=temp)
    out_fast = jax.block_until_ready(out_fast)
    np.testing.assert_allclose(np.asarray(out_fast), np.asarray(ref), rtol=5e-2, atol=5e-2)

    print("KERNEL_OK")
</pallas_src>

<mosaic_0001>
module attributes {stable_mosaic.version = 11 : i64} {
  func.func @_proj_kernel(%arg0: i32, %arg1: memref<256x32xf32, #tpu.memory_space<vmem>>, %arg2: memref<32x36xf32, #tpu.memory_space<vmem>>, %arg3: memref<1x36xf32, #tpu.memory_space<vmem>>, %arg4: memref<2x256x16xf32, #tpu.memory_space<vmem>>, %arg5: memref<2x256x1xf32, #tpu.memory_space<vmem>>, %arg6: memref<256x2xf32, #tpu.memory_space<vmem>>) attributes {dimension_semantics = [#tpu.dimension_semantics<parallel>], iteration_bounds = array<i64: 1>, scalar_prefetch = 0 : i64, scratch_operands = 0 : i64, tpu.core_type = #tpu.core_type<tc>, window_params = [{transform_indices = @transform_0, window_bounds = array<i64: 256, 32>}, {pipeline_mode = #tpu.pipeline_mode<synchronous>, transform_indices = @transform_1, window_bounds = array<i64: 32, 36>}, {pipeline_mode = #tpu.pipeline_mode<synchronous>, transform_indices = @transform_2, window_bounds = array<i64: 1, 36>}, {transform_indices = @transform_3, window_bounds = array<i64: 2, 256, 16>}, {transform_indices = @transform_4, window_bounds = array<i64: 2, 256, 1>}, {transform_indices = @transform_5, window_bounds = array<i64: 256, 2>}]} {
    %c0 = arith.constant 0 : index
    %c0_0 = arith.constant 0 : index
    %0 = vector.load %arg1[%c0, %c0_0] : memref<256x32xf32, #tpu.memory_space<vmem>>, vector<256x32xf32>
    %c0_1 = arith.constant 0 : index
    %c0_2 = arith.constant 0 : index
    %1 = vector.load %arg2[%c0_1, %c0_2] : memref<32x36xf32, #tpu.memory_space<vmem>>, vector<32x36xf32>
    %cst = arith.constant dense<0.000000e+00> : vector<256x36xf32>
    %2 = tpu.matmul %0, %1, %cst {dimension_numbers = #tpu.dot_dimension_numbers<[1], [0], [0], [1], [0, 0, 1, 1], [], []>} : vector<256x32xf32>, vector<32x36xf32>, vector<256x36xf32> -> vector<256x36xf32>
    %c0_3 = arith.constant 0 : index
    %c0_4 = arith.constant 0 : index
    %3 = vector.load %arg3[%c0_3, %c0_4] : memref<1x36xf32, #tpu.memory_space<vmem>>, vector<1x36xf32>
    %4 = vector.broadcast %3 : vector<1x36xf32> to vector<256x36xf32>
    %5 = arith.addf %2, %4 : vector<256x36xf32>
    %6 = vector.extract_strided_slice %5 {offsets = [0, 0], sizes = [256, 16], strides = [1, 1]} : vector<256x36xf32> to vector<256x16xf32>
    %c0_5 = arith.constant 0 : index
    %c0_6 = arith.constant 0 : index
    %c0_7 = arith.constant 0 : index
    %7 = vector.load %arg4[%c0_5, %c0_6, %c0_7] : memref<2x256x16xf32, #tpu.memory_space<vmem>>, vector<1x256x16xf32>
    %8 = vector.shape_cast %7 : vector<1x256x16xf32> to vector<256x16xf32>
    %9 = vector.shape_cast %6 : vector<256x16xf32> to vector<1x256x16xf32>
    tpu.vector_store %arg4[%c0_5, %c0_6, %c0_7], %9 {strides = array<i32>} : memref<2x256x16xf32, #tpu.memory_space<vmem>>, vector<1x256x16xf32>,
    %10 = vector.extract_strided_slice %5 {offsets = [0, 32], sizes = [256, 1], strides = [1, 1]} : vector<256x36xf32> to vector<256x1xf32>
    %c0_8 = arith.constant 0 : index
    %c0_9 = arith.constant 0 : index
    %c0_10 = arith.constant 0 : index
    %11 = vector.load %arg5[%c0_8, %c0_9, %c0_10] : memref<2x256x1xf32, #tpu.memory_space<vmem>>, vector<1x256x1xf32>
    %12 = vector.shape_cast %11 : vector<1x256x1xf32> to vector<256x1xf32>
    %13 = vector.shape_cast %10 : vector<256x1xf32> to vector<1x256x1xf32>
    tpu.vector_store %arg5[%c0_8, %c0_9, %c0_10], %13 {strides = array<i32>} : memref<2x256x1xf32, #tpu.memory_space<vmem>>, vector<1x256x1xf32>,
    %14 = vector.extract_strided_slice %5 {offsets = [0, 16], sizes = [256, 16], strides = [1, 1]} : vector<256x36xf32> to vector<256x16xf32>
    %c1 = arith.constant 1 : index
    %c0_11 = arith.constant 0 : index
    %c0_12 = arith.constant 0 : index
    %15 = vector.load %arg4[%c1, %c0_11, %c0_12] : memref<2x256x16xf32, #tpu.memory_space<vmem>>, vector<1x256x16xf32>
    %16 = vector.shape_cast %15 : vector<1x256x16xf32> to vector<256x16xf32>
    %17 = vector.shape_cast %14 : vector<256x16xf32> to vector<1x256x16xf32>
    tpu.vector_store %arg4[%c1, %c0_11, %c0_12], %17 {strides = array<i32>} : memref<2x256x16xf32, #tpu.memory_space<vmem>>, vector<1x256x16xf32>,
    %18 = vector.extract_strided_slice %5 {offsets = [0, 33], sizes = [256, 1], strides = [1, 1]} : vector<256x36xf32> to vector<256x1xf32>
    %c1_13 = arith.constant 1 : index
    %c0_14 = arith.constant 0 : index
    %c0_15 = arith.constant 0 : index
    %19 = vector.load %arg5[%c1_13, %c0_14, %c0_15] : memref<2x256x1xf32, #tpu.memory_space<vmem>>, vector<1x256x1xf32>
    %20 = vector.shape_cast %19 : vector<1x256x1xf32> to vector<256x1xf32>
    %21 = vector.shape_cast %18 : vector<256x1xf32> to vector<1x256x1xf32>
    tpu.vector_store %arg5[%c1_13, %c0_14, %c0_15], %21 {strides = array<i32>} : memref<2x256x1xf32, #tpu.memory_space<vmem>>, vector<1x256x1xf32>,
    %22 = vector.extract_strided_slice %5 {offsets = [0, 34], sizes = [256, 2], strides = [1, 1]} : vector<256x36xf32> to vector<256x2xf32>
    %c0_16 = arith.constant 0 : index
    %c0_17 = arith.constant 0 : index
    %23 = vector.load %arg6[%c0_16, %c0_17] : memref<256x2xf32, #tpu.memory_space<vmem>>, vector<256x2xf32>
    tpu.vector_store %arg6[%c0_16, %c0_17], %22 {strides = array<i32>} : memref<256x2xf32, #tpu.memory_space<vmem>>, vector<256x2xf32>,
    return
  }
  func.func @transform_0(%arg0: i32) -> (i32, i32) {
    %c0_i32 = arith.constant 0 : i32
    %c0_i32_0 = arith.constant 0 : i32
    return %arg0, %c0_i32 : i32, i32
  }
  func.func @transform_1(%arg0: i32) -> (i32, i32) {
    %c0_i32 = arith.constant 0 : i32
    %c0_i32_0 = arith.constant 0 : i32
    %c0_i32_1 = arith.constant 0 : i32
    return %c0_i32, %c0_i32_0 : i32, i32
  }
  func.func @transform_2(%arg0: i32) -> (i32, i32) {
    %c0_i32 = arith.constant 0 : i32
    %c0_i32_0 = arith.constant 0 : i32
    %c0_i32_1 = arith.constant 0 : i32
    return %c0_i32, %c0_i32_0 : i32, i32
  }
  func.func @transform_3(%arg0: i32) -> (i32, i32, i32) {
    %c0_i32 = arith.constant 0 : i32
    %c0_i32_0 = arith.constant 0 : i32
    %c0_i32_1 = arith.constant 0 : i32
    return %c0_i32, %arg0, %c0_i32_0 : i32, i32, i32
  }
  func.func @transform_4(%arg0: i32) -> (i32, i32, i32) {
    %c0_i32 = arith.constant 0 : i32
    %c0_i32_0 = arith.constant 0 : i32
    %c0_i32_1 = arith.constant 0 : i32
    return %c0_i32, %arg0, %c0_i32_0 : i32, i32, i32
  }
  func.func @transform_5(%arg0: i32) -> (i32, i32) {
    %c0_i32 = arith.constant 0 : i32
    %c0_i32_0 = arith.constant 0 : i32
    return %arg0, %c0_i32 : i32, i32
  }
}

</mosaic_0001>

<bundles_post_ra>
// kernel: tpu_custom_call.1
= control target key start
LH: loop header
LB: loop body
LE: loop exit
PB: predicated region body
PF: predicated region fallthrough
CT: control target
= control target key end

     0   :  { %vm60_vm0 = vcmask 261120   ;;  %vm382_vm1 = vcmask 130048   ;;  %s1180_s16 = smov 96   ;;  %s1181_s21 = smov 112   ;;  %vm543_vm2 = vcmask 7168   ;;  %vm930_vm3 = vcmask 15360   ;;  %s2383_s1 = inlined_call_operand.vmem [shape: f32[32,36], index: 1, kind: input, shape index: {}]   ;;  %s2384_s0 = inlined_call_operand.vmem [shape: f32[256,32], index: 0, kind: input, shape index: {}]   ;;  %s2385_s2 = inlined_call_operand.vmem [shape: f32[1,36], index: 2, kind: input, shape index: {}]   ;;  %s2386_s3 = inlined_call_operand.vmem [shape: f32[2,256,16], index: 3, kind: output, shape index: {0}]   ;;  %s2387_s4 = inlined_call_operand.vmem [shape: f32[2,256,1], index: 4, kind: output, shape index: {1}]   ;;  %s2388_s5 = inlined_call_operand.vmem [shape: f32[256,2], index: 5, kind: output, shape index: {2}]  }
   0x1   :  { %v49_v0 = vld [vmem:[%s2383_s1] sm:$0xff]  ;;  %v50_v1 = vld [vmem:[%s2383_s1 + $0x8] sm:$0xff]  ;;  %v51_v2 = vld [vmem:[%s2383_s1 + $0x10] sm:$0xff]  ;;  %s1182_s12 = smov 95   ;;  %s1183_s29 = smov 94  }
   0x2   :  { %v1164_v3 = vpack.c.bf16 %v50_v1, %v49_v0  ;;  %v52_v4 = vld [vmem:[%s2383_s1 + $0x18] sm:$0xff]  ;;  %v17_v5 = vld [vmem:[%s2384_s0] sm:$0xff]  ;;  %v18_v8 = vld [vmem:[%s2384_s0 + $0x8] sm:$0xff] }
   0x3   :  { %v33_v6 = vld [vmem:[%s2384_s0 + $0x80] sm:$0xff]  ;;  %v1168_v7 = vpack.c.bf16 %v52_v4, %v51_v2  ;;  %1116 = vmatprep.mubr.msk.f32.mxu0 %vm60_vm0, %v17_v5  ;;  %v34_v9 = vld [vmem:[%s2384_s0 + $0x88] sm:$0xff]  ;;  %v19_v10 = vld [vmem:[%s2384_s0 + $0x10] sm:$0xff] }
   0x4   :  { %1140 = vmatprep.mubr.msk.f32.mxu1 %vm60_vm0, %v33_v6  ;;  %1165 = vmatprep.subr.bf16.mxu0 %v1164_v3  ;;  %v35_v11 = vld [vmem:[%s2384_s0 + $0x90] sm:$0xff]  ;;  %v20_v12 = vld [vmem:[%s2384_s0 + $0x18] sm:$0xff]  ;;  %v21_v14 = vld [vmem:[%s2384_s0 + $0x20] sm:$0xff] }
   0x5   :  { %1172 = vmatprep.subr.bf16.mxu1 %v1164_v3  ;;  %1167 = vmatpush3.bf16.msra.mxu0 %v1164_v3  ;;  %v36_v13 = vld [vmem:[%s2384_s0 + $0x98] sm:$0xff]  ;;  %v37_v15 = vld [vmem:[%s2384_s0 + $0xa0] sm:$0xff]  ;;  %v22_v16 = vld [vmem:[%s2384_s0 + $0x28] sm:$0xff] }
   0x6   :  { %1174 = vmatpush3.bf16.msra.mxu1 %v1164_v3  ;;  %1169 = vmatprep.subr.bf16.mxu0 %v1168_v7  ;;  %v38_v17 = vld [vmem:[%s2384_s0 + $0xa8] sm:$0xff]  ;;  %v23_v18 = vld [vmem:[%s2384_s0 + $0x30] sm:$0xff]  ;;  %v24_v20 = vld [vmem:[%s2384_s0 + $0x38] sm:$0xff] }
   0x7   :  { %1173 = vmatprep.subr.bf16.mxu1 %v1168_v7  ;;  %v39_v19 = vld [vmem:[%s2384_s0 + $0xb0] sm:$0xff]  ;;  %v40_v21 = vld [vmem:[%s2384_s0 + $0xb8] sm:$0xff]  ;;  %v25_v22 = vld [vmem:[%s2384_s0 + $0x40] sm:$0xff] }
   0x8   :  { %v41_v23 = vld [vmem:[%s2384_s0 + $0xc0] sm:$0xff]  ;;  %v26_v24 = vld [vmem:[%s2384_s0 + $0x48] sm:$0xff]  ;;  %v27_v26 = vld [vmem:[%s2384_s0 + $0x50] sm:$0xff] }
   0x9   :  { %1171 = vmatpush3.bf16.msra.mxu0 %v1168_v7  ;;  %v42_v25 = vld [vmem:[%s2384_s0 + $0xc8] sm:$0xff]  ;;  %v43_v27 = vld [vmem:[%s2384_s0 + $0xd0] sm:$0xff]  ;;  %v28_v28 = vld [vmem:[%s2384_s0 + $0x58] sm:$0xff] }
   0xa   :  { %1175 = vmatpush3.bf16.msra.mxu1 %v1168_v7  ;;  %v44_v29 = vld [vmem:[%s2384_s0 + $0xd8] sm:$0xff]  ;;  %v29_v30 = vld [vmem:[%s2384_s0 + $0x60] sm:$0xff]  ;;  %v30_v32 = vld [vmem:[%s2384_s0 + $0x68] sm:$0xff] }
   0xb   :  { %v45_v31 = vld [vmem:[%s2384_s0 + $0xe0] sm:$0xff]  ;;  %v46_v33 = vld [vmem:[%s2384_s0 + $0xe8] sm:$0xff]  ;;  %v31_v34 = vld [vmem:[%s2384_s0 + $0x70] sm:$0xff] }
   0xc   :  { %1117 = vmatmul.mubr.msk.f32.vlgmr.msra.gmra.mrb[0].mxu0 %vm60_vm0, %v18_v8  ;;  %v32_v35 = vld [vmem:[%s2384_s0 + $0x78] sm:$0xff]  ;;  %v47_v36 = vld [vmem:[%s2384_s0 + $0xf0] sm:$0xff]  ;;  %v1357_v38 = vld [vmem:[%s2385_s2] ss:$0 sm:$0xff] }
   0xd   :  { %1141 = vmatmul.mubr.msk.f32.vlgmr.msra.gmra.mrb[0].mxu1 %vm60_vm0, %v34_v9  ;;  %1119 = vmatprep.mubr.msk.f32.mxu0 %vm60_vm0, %v19_v10  ;;  %v48_v37 = vld [vmem:[%s2384_s0 + $0xf8] sm:$0xff] }
   0xe   :  { %1143 = vmatprep.mubr.msk.f32.mxu1 %vm60_vm0, %v35_v11 }
  0x10   :  { %1120 = vmatmul.mubr.msk.f32.gmra.mrb[2].mxu0 %vm60_vm0, %v20_v12 }
  0x11   :  { %1144 = vmatmul.mubr.msk.f32.gmra.mrb[2].mxu1 %vm60_vm0, %v36_v13  ;;  %1122 = vmatprep.mubr.msk.f32.mxu0 %vm60_vm0, %v21_v14 }
  0x12   :  { %1146 = vmatprep.mubr.msk.f32.mxu1 %vm60_vm0, %v37_v15 }
  0x14   :  { %1123 = vmatmul.mubr.msk.f32.gmra.mrb[4].mxu0 %vm60_vm0, %v22_v16 }
  0x15   :  { %1147 = vmatmul.mubr.msk.f32.gmra.mrb[4].mxu1 %vm60_vm0, %v38_v17  ;;  %1125 = vmatprep.mubr.msk.f32.mxu0 %vm60_vm0, %v23_v18 }
  0x16   :  { %1149 = vmatprep.mubr.msk.f32.mxu1 %vm60_vm0, %v39_v19 }
  0x18   :  { %1126 = vmatmul.mubr.msk.f32.gmra.mrb[6].mxu0 %vm60_vm0, %v24_v20 }
  0x19   :  { %1150 = vmatmul.mubr.msk.f32.gmra.mrb[6].mxu1 %vm60_vm0, %v40_v21  ;;  %1128 = vmatprep.mubr.msk.f32.mxu0 %vm60_vm0, %v25_v22 }
  0x1a   :  { %1152 = vmatprep.mubr.msk.f32.mxu1 %vm60_vm0, %v41_v23 }
  0x1c   :  { %1129 = vmatmul.mubr.msk.f32.gmra.mrb[8].mxu0 %vm60_vm0, %v26_v24 }
  0x1d   :  { %1153 = vmatmul.mubr.msk.f32.gmra.mrb[8].mxu1 %vm60_vm0, %v42_v25  ;;  %1131 = vmatprep.mubr.msk.f32.mxu0 %vm60_vm0, %v27_v26 }
  0x1e   :  { %1155 = vmatprep.mubr.msk.f32.mxu1 %vm60_vm0, %v43_v27 }
  0x20   :  { %1132 = vmatmul.mubr.msk.f32.gmra.mrb[10].mxu0 %vm60_vm0, %v28_v28 }
  0x21   :  { %1156 = vmatmul.mubr.msk.f32.gmra.mrb[10].mxu1 %vm60_vm0, %v44_v29  ;;  %1134 = vmatprep.mubr.msk.f32.mxu0 %vm60_vm0, %v29_v30 }
  0x22   :  { %1158 = vmatprep.mubr.msk.f32.mxu1 %vm60_vm0, %v45_v31 }
  0x24   :  { %1135 = vmatmul.mubr.msk.f32.gmra.mrb[12].mxu0 %vm60_vm0, %v30_v32 }
  0x25   :  { %1159 = vmatmul.mubr.msk.f32.gmra.mrb[12].mxu1 %vm60_vm0, %v46_v33  ;;  %1137 = vmatprep.mubr.msk.f32.mxu0 %vm60_vm0, %v31_v34 }
  0x26   :  { %1161 = vmatprep.mubr.msk.f32.mxu1 %vm60_vm0, %v47_v36 }
  0x28   :  { %1138 = vmatmul.mubr.msk.f32.gmra.mrb[14].mxu0 %vm60_vm0, %v32_v35 }
  0x29   :  { %1162 = vmatmul.mubr.msk.f32.gmra.mrb[14].mxu1 %vm60_vm0, %v48_v37 }
  0xdf   :  { %v1118_v39 = vpop.f32.mrb[0].mxu0 }
  0xe0   :  { %v1142_v40 = vpop.f32.mrb[0].mxu1  ;;  %v1360_v41 = vadd.f32 %v1118_v39, %v1357_v38  ;;  %v223_v43 = vpop.f32.mrb[1].mxu0 }
  0xe1   :  { %v1363_v42 = vadd.f32 %v1142_v40, %v1357_v38  ;;  %v303_v44 = vpop.f32.mrb[1].mxu1  ;;  %v1366_v45 = vadd.f32 %v1357_v38, %v223_v43 }
  0xe2   :  { %v1369_v46 = vadd.f32 %v1357_v38, %v303_v44  ;;  %384 = vst.msk [vmem:[%s2386_s3 + $0x8] sm:$0xff] %vm382_vm1, %v1360_v41  ;;  %449 = vrot.lane.b32.xlu0 %v1360_v41, %s1180_s16 }
  0xe3   :  { %400 = vst.msk [vmem:[%s2386_s3 + $0x88] sm:$0xff] %vm382_vm1, %v1363_v42  ;;  %481 = vrot.lane.b32.xlu1 %v1363_v42, %s1180_s16  ;;  %383 = vst.msk [vmem:[%s2386_s3] sm:$0xff] %vm382_vm1, %v1366_v45  ;;  %v1121_v47 = vpop.f32.mrb[2].mxu0 }
  0xe4   :  { %399 = vst.msk [vmem:[%s2386_s3 + $0x80] sm:$0xff] %vm382_vm1, %v1369_v46  ;;  %v1145_v48 = vpop.f32.mrb[2].mxu1  ;;  %v1396_v49 = vadd.f32 %v1121_v47, %v1357_v38  ;;  %v233_v50 = vpop.f32.mrb[3].mxu0 }
  0xe5   :  { %v1399_v51 = vadd.f32 %v1145_v48, %v1357_v38  ;;  %v313_v52 = vpop.f32.mrb[3].mxu1  ;;  %v1402_v53 = vadd.f32 %v1357_v38, %v233_v50 }
  0xe6   :  { %v1405_v54 = vadd.f32 %v1357_v38, %v313_v52  ;;  %447 = vrot.lane.b32.xlu0 %v1366_v45, %s1180_s16  ;;  %386 = vst.msk [vmem:[%s2386_s3 + $0x18] sm:$0xff] %vm382_vm1, %v1396_v49 }
  0xe7   :  { %578 = vrot.lane.b32.xlu1 %v1360_v41, %s1181_s21  ;;  %402 = vst.msk [vmem:[%s2386_s3 + $0x98] sm:$0xff] %vm382_vm1, %v1399_v51  ;;  %385 = vst.msk [vmem:[%s2386_s3 + $0x10] sm:$0xff] %vm382_vm1, %v1402_v53  ;;  %v1124_v55 = vpop.f32.mrb[4].mxu0 }
  0xe8   :  { %401 = vst.msk [vmem:[%s2386_s3 + $0x90] sm:$0xff] %vm382_vm1, %v1405_v54  ;;  %v1148_v56 = vpop.f32.mrb[4].mxu1  ;;  %v1432_v57 = vadd.f32 %v1124_v55, %v1357_v38  ;;  %v243_v58 = vpop.f32.mrb[5].mxu0 }
  0xe9   :  { %v1435_v59 = vadd.f32 %v1148_v56, %v1357_v38  ;;  %v323_v60 = vpop.f32.mrb[5].mxu1  ;;  %v1438_v61 = vadd.f32 %v1357_v38, %v243_v58 }
  0xea   :  { %v1441_v62 = vadd.f32 %v1357_v38, %v323_v60  ;;  %479 = vrot.lane.b32.xlu0 %v1369_v46, %s1180_s16  ;;  %388 = vst.msk [vmem:[%s2386_s3 + $0x28] sm:$0xff] %vm382_vm1, %v1432_v57 }
  0xeb   :  { %610 = vrot.lane.b32.xlu1 %v1363_v42, %s1181_s21  ;;  %404 = vst.msk [vmem:[%s2386_s3 + $0xa8] sm:$0xff] %vm382_vm1, %v1435_v59  ;;  %387 = vst.msk [vmem:[%s2386_s3 + $0x20] sm:$0xff] %vm382_vm1, %v1438_v61  ;;  %v1127_v63 = vpop.f32.mrb[6].mxu0 }
  0xec   :  { %403 = vst.msk [vmem:[%s2386_s3 + $0xa0] sm:$0xff] %vm382_vm1, %v1441_v62  ;;  %v1151_v0 = vpop.f32.mrb[6].mxu1  ;;  %v1468_v1 = vadd.f32 %v1127_v63, %v1357_v38  ;;  %v253_v2 = vpop.f32.mrb[7].mxu0 }
  0xed   :  { %v1471_v3 = vadd.f32 %v1151_v0, %v1357_v38  ;;  %v333_v4 = vpop.f32.mrb[7].mxu1  ;;  %v1474_v5 = vadd.f32 %v1357_v38, %v253_v2 }
  0xee   :  { %v1477_v6 = vadd.f32 %v1357_v38, %v333_v4  ;;  %576 = vrot.lane.b32.xlu0 %v1366_v45, %s1181_s21  ;;  %390 = vst.msk [vmem:[%s2386_s3 + $0x38] sm:$0xff] %vm382_vm1, %v1468_v1 }
  0xef   :  { %707 = vrot.lane.b32.xlu1 %v1360_v41, %s1182_s12  ;;  %406 = vst.msk [vmem:[%s2386_s3 + $0xb8] sm:$0xff] %vm382_vm1, %v1471_v3  ;;  %389 = vst.msk [vmem:[%s2386_s3 + $0x30] sm:$0xff] %vm382_vm1, %v1474_v5  ;;  %v1130_v7 = vpop.f32.mrb[8].mxu0 }
  0xf0   :  { %405 = vst.msk [vmem:[%s2386_s3 + $0xb0] sm:$0xff] %vm382_vm1, %v1477_v6  ;;  %v1154_v8 = vpop.f32.mrb[8].mxu1  ;;  %v1504_v9 = vadd.f32 %v1130_v7, %v1357_v38  ;;  %v263_v10 = vpop.f32.mrb[9].mxu0 }
  0xf1   :  { %v1507_v11 = vadd.f32 %v1154_v8, %v1357_v38  ;;  %v343_v12 = vpop.f32.mrb[9].mxu1  ;;  %v1510_v13 = vadd.f32 %v1357_v38, %v263_v10 }
  0xf2   :  { %v1513_v14 = vadd.f32 %v1357_v38, %v343_v12  ;;  %608 = vrot.lane.b32.xlu0 %v1369_v46, %s1181_s21  ;;  %392 = vst.msk [vmem:[%s2386_s3 + $0x48] sm:$0xff] %vm382_vm1, %v1504_v9 }
  0xf3   :  { %739 = vrot.lane.b32.xlu1 %v1363_v42, %s1182_s12  ;;  %408 = vst.msk [vmem:[%s2386_s3 + $0xc8] sm:$0xff] %vm382_vm1, %v1507_v11  ;;  %391 = vst.msk [vmem:[%s2386_s3 + $0x40] sm:$0xff] %vm382_vm1, %v1510_v13  ;;  %v1133_v15 = vpop.f32.mrb[10].mxu0 }
  0xf4   :  { %407 = vst.msk [vmem:[%s2386_s3 + $0xc0] sm:$0xff] %vm382_vm1, %v1513_v14  ;;  %v1552_v16 = vadd.f32 %v1133_v15, %v1357_v38  ;;  %v273_v17 = vpop.f32.mrb[11].mxu0  ;;  %v1157_v19 = vpop.f32.mrb[10].mxu1 }
  0xf5   :  { %v1555_v18 = vadd.f32 %v1357_v38, %v273_v17  ;;  %v1572_v20 = vadd.f32 %v1157_v19, %v1357_v38  ;;  %v353_v21 = vpop.f32.mrb[11].mxu1 }
  0xf6   :  { %705 = vrot.lane.b32.xlu0 %v1366_v45, %s1182_s12  ;;  %394 = vst.msk [vmem:[%s2386_s3 + $0x58] sm:$0xff] %vm382_vm1, %v1552_v16  ;;  %v1575_v22 = vadd.f32 %v1357_v38, %v353_v21 }
  0xf7   :  { %836 = vrot.lane.b32.xlu1 %v1360_v41, %s1183_s29  ;;  %393 = vst.msk [vmem:[%s2386_s3 + $0x50] sm:$0xff] %vm382_vm1, %v1555_v18  ;;  %410 = vst.msk [vmem:[%s2386_s3 + $0xd8] sm:$0xff] %vm382_vm1, %v1572_v20  ;;  %v1136_v23 = vpop.f32.mrb[12].mxu0 }
  0xf8   :  { %409 = vst.msk [vmem:[%s2386_s3 + $0xd0] sm:$0xff] %vm382_vm1, %v1575_v22  ;;  %v1616_v24 = vadd.f32 %v1136_v23, %v1357_v38  ;;  %v283_v25 = vpop.f32.mrb[13].mxu0  ;;  %v1160_v27 = vpop.f32.mrb[12].mxu1 }
  0xf9   :  { %v1619_v26 = vadd.f32 %v1357_v38, %v283_v25  ;;  %v1636_v28 = vadd.f32 %v1160_v27, %v1357_v38  ;;  %v363_v29 = vpop.f32.mrb[13].mxu1 }
  0xfa   :  { %737 = vrot.lane.b32.xlu0 %v1369_v46, %s1182_s12  ;;  %396 = vst.msk [vmem:[%s2386_s3 + $0x68] sm:$0xff] %vm382_vm1, %v1616_v24  ;;  %v1639_v30 = vadd.f32 %v1357_v38, %v363_v29 }
  0xfb   :  { %868 = vrot.lane.b32.xlu1 %v1363_v42, %s1183_s29  ;;  %395 = vst.msk [vmem:[%s2386_s3 + $0x60] sm:$0xff] %vm382_vm1, %v1619_v26  ;;  %412 = vst.msk [vmem:[%s2386_s3 + $0xe8] sm:$0xff] %vm382_vm1, %v1636_v28  ;;  %v1139_v31 = vpop.f32.mrb[14].mxu0 }
  0xfc   :  { %411 = vst.msk [vmem:[%s2386_s3 + $0xe0] sm:$0xff] %vm382_vm1, %v1639_v30  ;;  %v1680_v32 = vadd.f32 %v1139_v31, %v1357_v38  ;;  %v293_v33 = vpop.f32.mrb[15].mxu0  ;;  %v1163_v35 = vpop.f32.mrb[14].mxu1 }
  0xfd   :  { %v1683_v34 = vadd.f32 %v1357_v38, %v293_v33  ;;  %v1700_v36 = vadd.f32 %v1163_v35, %v1357_v38  ;;  %v373_v37 = vpop.f32.mrb[15].mxu1 }
  0xfe   :  { %834 = vrot.lane.b32.xlu0 %v1366_v45, %s1183_s29  ;;  %398 = vst.msk [vmem:[%s2386_s3 + $0x78] sm:$0xff] %vm382_vm1, %v1680_v32  ;;  %v1703_v39 = vadd.f32 %v1357_v38, %v373_v37 }
  0xff   :  { %453 = vrot.lane.b32.xlu1 %v1396_v49, %s1180_s16  ;;  %397 = vst.msk [vmem:[%s2386_s3 + $0x70] sm:$0xff] %vm382_vm1, %v1683_v34  ;;  %414 = vst.msk [vmem:[%s2386_s3 + $0xf8] sm:$0xff] %vm382_vm1, %v1700_v36 }
 0x100   :  { %413 = vst.msk [vmem:[%s2386_s3 + $0xf0] sm:$0xff] %vm382_vm1, %v1703_v39 }
 0x102   :  { %866 = vrot.lane.b32.xlu0 %v1369_v46, %s1183_s29 }
 0x103   :  { %485 = vrot.lane.b32.xlu1 %v1399_v51, %s1180_s16 }
 0x106   :  { %483 = vrot.lane.b32.xlu0 %v1405_v54, %s1180_s16 }
 0x107   :  { %582 = vrot.lane.b32.xlu1 %v1396_v49, %s1181_s21 }
 0x10a   :  { %580 = vrot.lane.b32.xlu0 %v1402_v53, %s1181_s21 }
 0x10b   :  { %614 = vrot.lane.b32.xlu1 %v1399_v51, %s1181_s21 }
 0x10e   :  { %612 = vrot.lane.b32.xlu0 %v1405_v54, %s1181_s21 }
 0x10f   :  { %711 = vrot.lane.b32.xlu1 %v1396_v49, %s1182_s12 }
 0x112   :  { %709 = vrot.lane.b32.xlu0 %v1402_v53, %s1182_s12 }
 0x113   :  { %743 = vrot.lane.b32.xlu1 %v1399_v51, %s1182_s12 }
 0x116   :  { %741 = vrot.lane.b32.xlu0 %v1405_v54, %s1182_s12 }
 0x117   :  { %840 = vrot.lane.b32.xlu1 %v1396_v49, %s1183_s29 }
 0x11a   :  { %838 = vrot.lane.b32.xlu0 %v1402_v53, %s1183_s29 }
 0x11b   :  { %872 = vrot.lane.b32.xlu1 %v1399_v51, %s1183_s29 }
 0x11e   :  { %870 = vrot.lane.b32.xlu0 %v1405_v54, %s1183_s29 }
 0x11f   :  { %451 = vrot.lane.b32.xlu1 %v1402_v53, %s1180_s16 }
 0x122   :  { %455 = vrot.lane.b32.xlu0 %v1438_v61, %s1180_s16 }
 0x123   :  { %457 = vrot.lane.b32.xlu1 %v1432_v57, %s1180_s16 }
 0x126   :  { %487 = vrot.lane.b32.xlu0 %v1441_v62, %s1180_s16 }
 0x127   :  { %489 = vrot.lane.b32.xlu1 %v1435_v59, %s1180_s16 }
 0x12a   :  { %584 = vrot.lane.b32.xlu0 %v1438_v61, %s1181_s21 }
 0x12b   :  { %586 = vrot.lane.b32.xlu1 %v1432_v57, %s1181_s21 }
 0x12e   :  { %616 = vrot.lane.b32.xlu0 %v1441_v62, %s1181_s21 }
 0x12f   :  { %618 = vrot.lane.b32.xlu1 %v1435_v59, %s1181_s21 }
 0x132   :  { %713 = vrot.lane.b32.xlu0 %v1438_v61, %s1182_s12 }
 0x133   :  { %715 = vrot.lane.b32.xlu1 %v1432_v57, %s1182_s12 }
 0x136   :  { %745 = vrot.lane.b32.xlu0 %v1441_v62, %s1182_s12 }
 0x137   :  { %747 = vrot.lane.b32.xlu1 %v1435_v59, %s1182_s12 }
 0x13a   :  { %842 = vrot.lane.b32.xlu0 %v1438_v61, %s1183_s29 }
 0x13b   :  { %844 = vrot.lane.b32.xlu1 %v1432_v57, %s1183_s29 }
 0x13e   :  { %874 = vrot.lane.b32.xlu0 %v1441_v62, %s1183_s29 }
 0x13f   :  { %876 = vrot.lane.b32.xlu1 %v1435_v59, %s1183_s29 }
 0x142   :  { %459 = vrot.lane.b32.xlu0 %v1474_v5, %s1180_s16 }
 0x143   :  { %461 = vrot.lane.b32.xlu1 %v1468_v1, %s1180_s16 }
 0x146   :  { %491 = vrot.lane.b32.xlu0 %v1477_v6, %s1180_s16 }
 0x147   :  { %493 = vrot.lane.b32.xlu1 %v1471_v3, %s1180_s16 }
 0x14a   :  { %588 = vrot.lane.b32.xlu0 %v1474_v5, %s1181_s21 }
 0x14b   :  { %590 = vrot.lane.b32.xlu1 %v1468_v1, %s1181_s21 }
 0x14e   :  { %620 = vrot.lane.b32.xlu0 %v1477_v6, %s1181_s21 }
 0x14f   :  { %622 = vrot.lane.b32.xlu1 %v1471_v3, %s1181_s21 }
 0x152   :  { %717 = vrot.lane.b32.xlu0 %v1474_v5, %s1182_s12 }
 0x153   :  { %719 = vrot.lane.b32.xlu1 %v1468_v1, %s1182_s12 }
 0x154   :  { %v450_v40 = vpop.permute.xlu0 %449 }
 0x155   :  { %v482_v38 = vpop.permute.xlu1 %481  ;;  %545 = vst.msk [vmem:[%s2387_s4 + $0x8] sm:$0xff] %vm543_vm2, %v450_v40 }
 0x156   :  { %561 = vst.msk [vmem:[%s2387_s4 + $0x88] sm:$0xff] %vm543_vm2, %v482_v38  ;;  %749 = vrot.lane.b32.xlu0 %v1477_v6, %s1182_s12 }
 0x157   :  { %751 = vrot.lane.b32.xlu1 %v1471_v3, %s1182_s12 }
 0x158   :  { %v448_v42 = vpop.permute.xlu0 %447 }
 0x159   :  { %v579_v41 = vpop.permute.xlu1 %578  ;;  %544 = vst.msk [vmem:[%s2387_s4] sm:$0xff] %vm543_vm2, %v448_v42 }
 0x15a   :  { %1009 = vst.msk [vmem:[%s2386_s3 + $0x108] sm:$0xff] %vm382_vm1, %v579_v41  ;;  %846 = vrot.lane.b32.xlu0 %v1474_v5, %s1183_s29 }
 0x15b   :  { %848 = vrot.lane.b32.xlu1 %v1468_v1, %s1183_s29 }
 0x15c   :  { %v480_v44 = vpop.permute.xlu0 %479 }
 0x15d   :  { %v611_v43 = vpop.permute.xlu1 %610  ;;  %560 = vst.msk [vmem:[%s2387_s4 + $0x80] sm:$0xff] %vm543_vm2, %v480_v44 }
 0x15e   :  { %1025 = vst.msk [vmem:[%s2386_s3 + $0x188] sm:$0xff] %vm382_vm1, %v611_v43  ;;  %878 = vrot.lane.b32.xlu0 %v1477_v6, %s1183_s29 }
 0x15f   :  { %880 = vrot.lane.b32.xlu1 %v1471_v3, %s1183_s29 }
 0x160   :  { %v577_v46 = vpop.permute.xlu0 %576 }
 0x161   :  { %v708_v45 = vpop.permute.xlu1 %707  ;;  %1008 = vst.msk [vmem:[%s2386_s3 + $0x100] sm:$0xff] %vm382_vm1, %v577_v46 }
 0x162   :  { %1041 = vst.msk [vmem:[%s2387_s4 + $0x108] sm:$0xff] %vm543_vm2, %v708_v45  ;;  %463 = vrot.lane.b32.xlu0 %v1510_v13, %s1180_s16 }
 0x163   :  { %465 = vrot.lane.b32.xlu1 %v1504_v9, %s1180_s16 }
 0x164   :  { %v609_v48 = vpop.permute.xlu0 %608 }
 0x165   :  { %v740_v47 = vpop.permute.xlu1 %739  ;;  %1024 = vst.msk [vmem:[%s2386_s3 + $0x180] sm:$0xff] %vm382_vm1, %v609_v48 }
 0x166   :  { %1057 = vst.msk [vmem:[%s2387_s4 + $0x188] sm:$0xff] %vm543_vm2, %v740_v47  ;;  %495 = vrot.lane.b32.xlu0 %v1513_v14, %s1180_s16 }
 0x167   :  { %497 = vrot.lane.b32.xlu1 %v1507_v11, %s1180_s16 }
 0x168   :  { %v706_v50 = vpop.permute.xlu0 %705 }
 0x169   :  { %v837_v49 = vpop.permute.xlu1 %836  ;;  %1040 = vst.msk [vmem:[%s2387_s4 + $0x100] sm:$0xff] %vm543_vm2, %v706_v50 }
 0x16a   :  { %932 = vst.msk [vmem:[%s2388_s5 + $0x8] sm:$0xff] %vm930_vm3, %v837_v49  ;;  %592 = vrot.lane.b32.xlu0 %v1510_v13, %s1181_s21 }
 0x16b   :  { %594 = vrot.lane.b32.xlu1 %v1504_v9, %s1181_s21 }
 0x16c   :  { %v738_v52 = vpop.permute.xlu0 %737 }
 0x16d   :  { %v869_v51 = vpop.permute.xlu1 %868  ;;  %1056 = vst.msk [vmem:[%s2387_s4 + $0x180] sm:$0xff] %vm543_vm2, %v738_v52 }
 0x16e   :  { %948 = vst.msk [vmem:[%s2388_s5 + $0x88] sm:$0xff] %vm930_vm3, %v869_v51  ;;  %624 = vrot.lane.b32.xlu0 %v1513_v14, %s1181_s21 }
 0x16f   :  { %626 = vrot.lane.b32.xlu1 %v1507_v11, %s1181_s21 }
 0x170   :  { %v835_v54 = vpop.permute.xlu0 %834 }
 0x171   :  { %v454_v53 = vpop.permute.xlu1 %453  ;;  %931 = vst.msk [vmem:[%s2388_s5] sm:$0xff] %vm930_vm3, %v835_v54 }
 0x172   :  { %547 = vst.msk [vmem:[%s2387_s4 + $0x18] sm:$0xff] %vm543_vm2, %v454_v53  ;;  %721 = vrot.lane.b32.xlu0 %v1510_v13, %s1182_s12 }
 0x173   :  { %723 = vrot.lane.b32.xlu1 %v1504_v9, %s1182_s12 }
 0x174   :  { %v867_v56 = vpop.permute.xlu0 %866 }
 0x175   :  { %v486_v55 = vpop.permute.xlu1 %485  ;;  %947 = vst.msk [vmem:[%s2388_s5 + $0x80] sm:$0xff] %vm930_vm3, %v867_v56 }
 0x176   :  { %563 = vst.msk [vmem:[%s2387_s4 + $0x98] sm:$0xff] %vm543_vm2, %v486_v55  ;;  %753 = vrot.lane.b32.xlu0 %v1513_v14, %s1182_s12 }
 0x177   :  { %755 = vrot.lane.b32.xlu1 %v1507_v11, %s1182_s12 }
 0x178   :  { %v484_v58 = vpop.permute.xlu0 %483 }
 0x179   :  { %v583_v57 = vpop.permute.xlu1 %582  ;;  %562 = vst.msk [vmem:[%s2387_s4 + $0x90] sm:$0xff] %vm543_vm2, %v484_v58 }
 0x17a   :  { %1011 = vst.msk [vmem:[%s2386_s3 + $0x118] sm:$0xff] %vm382_vm1, %v583_v57  ;;  %850 = vrot.lane.b32.xlu0 %v1510_v13, %s1183_s29 }
 0x17b   :  { %852 = vrot.lane.b32.xlu1 %v1504_v9, %s1183_s29 }
 0x17c   :  { %v581_v60 = vpop.permute.xlu0 %580 }
 0x17d   :  { %v615_v59 = vpop.permute.xlu1 %614  ;;  %1010 = vst.msk [vmem:[%s2386_s3 + $0x110] sm:$0xff] %vm382_vm1, %v581_v60 }
 0x17e   :  { %1027 = vst.msk [vmem:[%s2386_s3 + $0x198] sm:$0xff] %vm382_vm1, %v615_v59  ;;  %882 = vrot.lane.b32.xlu0 %v1513_v14, %s1183_s29 }
 0x17f   :  { %884 = vrot.lane.b32.xlu1 %v1507_v11, %s1183_s29 }
 0x180   :  { %v613_v62 = vpop.permute.xlu0 %612 }
 0x181   :  { %v712_v61 = vpop.permute.xlu1 %711  ;;  %1026 = vst.msk [vmem:[%s2386_s3 + $0x190] sm:$0xff] %vm382_vm1, %v613_v62 }
 0x182   :  { %1043 = vst.msk [vmem:[%s2387_s4 + $0x118] sm:$0xff] %vm543_vm2, %v712_v61  ;;  %467 = vrot.lane.b32.xlu0 %v1555_v18, %s1180_s16 }
 0x183   :  { %469 = vrot.lane.b32.xlu1 %v1552_v16, %s1180_s16 }
 0x184   :  { %v710_v0 = vpop.permute.xlu0 %709 }
 0x185   :  { %v744_v63 = vpop.permute.xlu1 %743  ;;  %1042 = vst.msk [vmem:[%s2387_s4 + $0x110] sm:$0xff] %vm543_vm2, %v710_v0 }
 0x186   :  { %1059 = vst.msk [vmem:[%s2387_s4 + $0x198] sm:$0xff] %vm543_vm2, %v744_v63  ;;  %499 = vrot.lane.b32.xlu0 %v1575_v22, %s1180_s16 }
 0x187   :  { %501 = vrot.lane.b32.xlu1 %v1572_v20, %s1180_s16 }
 0x188   :  { %v742_v2 = vpop.permute.xlu0 %741 }
 0x189   :  { %v841_v1 = vpop.permute.xlu1 %840  ;;  %1058 = vst.msk [vmem:[%s2387_s4 + $0x190] sm:$0xff] %vm543_vm2, %v742_v2 }
 0x18a   :  { %934 = vst.msk [vmem:[%s2388_s5 + $0x18] sm:$0xff] %vm930_vm3, %v841_v1  ;;  %596 = vrot.lane.b32.xlu0 %v1555_v18, %s1181_s21 }
 0x18b   :  { %598 = vrot.lane.b32.xlu1 %v1552_v16, %s1181_s21 }
 0x18c   :  { %v839_v4 = vpop.permute.xlu0 %838 }
 0x18d   :  { %v873_v3 = vpop.permute.xlu1 %872  ;;  %933 = vst.msk [vmem:[%s2388_s5 + $0x10] sm:$0xff] %vm930_vm3, %v839_v4 }
 0x18e   :  { %950 = vst.msk [vmem:[%s2388_s5 + $0x98] sm:$0xff] %vm930_vm3, %v873_v3  ;;  %628 = vrot.lane.b32.xlu0 %v1575_v22, %s1181_s21 }
 0x18f   :  { %630 = vrot.lane.b32.xlu1 %v1572_v20, %s1181_s21 }
 0x190   :  { %v871_v6 = vpop.permute.xlu0 %870 }
 0x191   :  { %v452_v5 = vpop.permute.xlu1 %451  ;;  %949 = vst.msk [vmem:[%s2388_s5 + $0x90] sm:$0xff] %vm930_vm3, %v871_v6 }
 0x192   :  { %546 = vst.msk [vmem:[%s2387_s4 + $0x10] sm:$0xff] %vm543_vm2, %v452_v5  ;;  %725 = vrot.lane.b32.xlu0 %v1555_v18, %s1182_s12 }
 0x193   :  { %727 = vrot.lane.b32.xlu1 %v1552_v16, %s1182_s12 }
 0x194   :  { %v456_v8 = vpop.permute.xlu0 %455 }
 0x195   :  { %v458_v7 = vpop.permute.xlu1 %457  ;;  %548 = vst.msk [vmem:[%s2387_s4 + $0x20] sm:$0xff] %vm543_vm2, %v456_v8 }
 0x196   :  { %549 = vst.msk [vmem:[%s2387_s4 + $0x28] sm:$0xff] %vm543_vm2, %v458_v7  ;;  %757 = vrot.lane.b32.xlu0 %v1575_v22, %s1182_s12 }
 0x197   :  { %759 = vrot.lane.b32.xlu1 %v1572_v20, %s1182_s12 }
 0x198   :  { %v488_v10 = vpop.permute.xlu0 %487 }
 0x199   :  { %v490_v9 = vpop.permute.xlu1 %489  ;;  %564 = vst.msk [vmem:[%s2387_s4 + $0xa0] sm:$0xff] %vm543_vm2, %v488_v10 }
 0x19a   :  { %565 = vst.msk [vmem:[%s2387_s4 + $0xa8] sm:$0xff] %vm543_vm2, %v490_v9  ;;  %854 = vrot.lane.b32.xlu0 %v1555_v18, %s1183_s29 }
 0x19b   :  { %856 = vrot.lane.b32.xlu1 %v1552_v16, %s1183_s29 }
 0x19c   :  { %v585_v12 = vpop.permute.xlu0 %584 }
 0x19d   :  { %v587_v11 = vpop.permute.xlu1 %586  ;;  %1012 = vst.msk [vmem:[%s2386_s3 + $0x120] sm:$0xff] %vm382_vm1, %v585_v12 }
 0x19e   :  { %1013 = vst.msk [vmem:[%s2386_s3 + $0x128] sm:$0xff] %vm382_vm1, %v587_v11  ;;  %886 = vrot.lane.b32.xlu0 %v1575_v22, %s1183_s29 }
 0x19f   :  { %888 = vrot.lane.b32.xlu1 %v1572_v20, %s1183_s29 }
 0x1a0   :  { %v617_v14 = vpop.permute.xlu0 %616 }
 0x1a1   :  { %v619_v13 = vpop.permute.xlu1 %618  ;;  %1028 = vst.msk [vmem:[%s2386_s3 + $0x1a0] sm:$0xff] %vm382_vm1, %v617_v14 }
 0x1a2   :  { %1029 = vst.msk [vmem:[%s2386_s3 + $0x1a8] sm:$0xff] %vm382_vm1, %v619_v13  ;;  %471 = vrot.lane.b32.xlu0 %v1619_v26, %s1180_s16 }
 0x1a3   :  { %473 = vrot.lane.b32.xlu1 %v1616_v24, %s1180_s16 }
 0x1a4   :  { %v714_v16 = vpop.permute.xlu0 %713 }
 0x1a5   :  { %v716_v15 = vpop.permute.xlu1 %715  ;;  %1044 = vst.msk [vmem:[%s2387_s4 + $0x120] sm:$0xff] %vm543_vm2, %v714_v16 }
 0x1a6   :  { %1045 = vst.msk [vmem:[%s2387_s4 + $0x128] sm:$0xff] %vm543_vm2, %v716_v15  ;;  %503 = vrot.lane.b32.xlu0 %v1639_v30, %s1180_s16 }
 0x1a7   :  { %505 = vrot.lane.b32.xlu1 %v1636_v28, %s1180_s16 }
 0x1a8   :  { %v746_v18 = vpop.permute.xlu0 %745 }
 0x1a9   :  { %v748_v17 = vpop.permute.xlu1 %747  ;;  %1060 = vst.msk [vmem:[%s2387_s4 + $0x1a0] sm:$0xff] %vm543_vm2, %v746_v18 }
 0x1aa   :  { %1061 = vst.msk [vmem:[%s2387_s4 + $0x1a8] sm:$0xff] %vm543_vm2, %v748_v17  ;;  %600 = vrot.lane.b32.xlu0 %v1619_v26, %s1181_s21 }
 0x1ab   :  { %602 = vrot.lane.b32.xlu1 %v1616_v24, %s1181_s21 }
 0x1ac   :  { %v843_v20 = vpop.permute.xlu0 %842 }
 0x1ad   :  { %v845_v19 = vpop.permute.xlu1 %844  ;;  %935 = vst.msk [vmem:[%s2388_s5 + $0x20] sm:$0xff] %vm930_vm3, %v843_v20 }
 0x1ae   :  { %936 = vst.msk [vmem:[%s2388_s5 + $0x28] sm:$0xff] %vm930_vm3, %v845_v19  ;;  %632 = vrot.lane.b32.xlu0 %v1639_v30, %s1181_s21 }
 0x1af   :  { %634 = vrot.lane.b32.xlu1 %v1636_v28, %s1181_s21 }
 0x1b0   :  { %v875_v22 = vpop.permute.xlu0 %874 }
 0x1b1   :  { %v877_v21 = vpop.permute.xlu1 %876  ;;  %951 = vst.msk [vmem:[%s2388_s5 + $0xa0] sm:$0xff] %vm930_vm3, %v875_v22 }
 0x1b2   :  { %952 = vst.msk [vmem:[%s2388_s5 + $0xa8] sm:$0xff] %vm930_vm3, %v877_v21  ;;  %729 = vrot.lane.b32.xlu0 %v1619_v26, %s1182_s12 }
 0x1b3   :  { %731 = vrot.lane.b32.xlu1 %v1616_v24, %s1182_s12 }
 0x1b4   :  { %v460_v25 = vpop.permute.xlu0 %459 }
 0x1b5   :  { %v462_v23 = vpop.permute.xlu1 %461  ;;  %550 = vst.msk [vmem:[%s2387_s4 + $0x30] sm:$0xff] %vm543_vm2, %v460_v25 }
 0x1b6   :  { %551 = vst.msk [vmem:[%s2387_s4 + $0x38] sm:$0xff] %vm543_vm2, %v462_v23  ;;  %761 = vrot.lane.b32.xlu0 %v1639_v30, %s1182_s12 }
 0x1b7   :  { %763 = vrot.lane.b32.xlu1 %v1636_v28, %s1182_s12 }
 0x1b8   :  { %v492_v29 = vpop.permute.xlu0 %491 }
 0x1b9   :  { %v494_v27 = vpop.permute.xlu1 %493  ;;  %566 = vst.msk [vmem:[%s2387_s4 + $0xb0] sm:$0xff] %vm543_vm2, %v492_v29 }
 0x1ba   :  { %567 = vst.msk [vmem:[%s2387_s4 + $0xb8] sm:$0xff] %vm543_vm2, %v494_v27  ;;  %858 = vrot.lane.b32.xlu0 %v1619_v26, %s1183_s29 }
 0x1bb   :  { %860 = vrot.lane.b32.xlu1 %v1616_v24, %s1183_s29 }
 0x1bc   :  { %v589_v33 = vpop.permute.xlu0 %588 }
 0x1bd   :  { %v591_v31 = vpop.permute.xlu1 %590  ;;  %1014 = vst.msk [vmem:[%s2386_s3 + $0x130] sm:$0xff] %vm382_vm1, %v589_v33 }
 0x1be   :  { %1015 = vst.msk [vmem:[%s2386_s3 + $0x138] sm:$0xff] %vm382_vm1, %v591_v31  ;;  %890 = vrot.lane.b32.xlu0 %v1639_v30, %s1183_s29 }
 0x1bf   :  { %892 = vrot.lane.b32.xlu1 %v1636_v28, %s1183_s29 }
 0x1c0   :  { %v621_v26 = vpop.permute.xlu0 %620 }
 0x1c1   :  { %v623_v24 = vpop.permute.xlu1 %622  ;;  %1030 = vst.msk [vmem:[%s2386_s3 + $0x1b0] sm:$0xff] %vm382_vm1, %v621_v26 }
 0x1c2   :  { %1031 = vst.msk [vmem:[%s2386_s3 + $0x1b8] sm:$0xff] %vm382_vm1, %v623_v24  ;;  %475 = vrot.lane.b32.xlu0 %v1683_v34, %s1180_s16 }
 0x1c3   :  { %477 = vrot.lane.b32.xlu1 %v1680_v32, %s1180_s16 }
 0x1c4   :  { %v718_v30 = vpop.permute.xlu0 %717 }
 0x1c5   :  { %v720_v28 = vpop.permute.xlu1 %719  ;;  %1046 = vst.msk [vmem:[%s2387_s4 + $0x130] sm:$0xff] %vm543_vm2, %v718_v30 }
 0x1c6   :  { %1047 = vst.msk [vmem:[%s2387_s4 + $0x138] sm:$0xff] %vm543_vm2, %v720_v28  ;;  %507 = vrot.lane.b32.xlu0 %v1703_v39, %s1180_s16 }
 0x1c7   :  { %509 = vrot.lane.b32.xlu1 %v1700_v36, %s1180_s16 }
 0x1c8   :  { %v750_v37 = vpop.permute.xlu0 %749 }
 0x1c9   :  { %v752_v35 = vpop.permute.xlu1 %751  ;;  %1062 = vst.msk [vmem:[%s2387_s4 + $0x1b0] sm:$0xff] %vm543_vm2, %v750_v37 }
 0x1ca   :  { %1063 = vst.msk [vmem:[%s2387_s4 + $0x1b8] sm:$0xff] %vm543_vm2, %v752_v35  ;;  %604 = vrot.lane.b32.xlu0 %v1683_v34, %s1181_s21 }
 0x1cb   :  { %606 = vrot.lane.b32.xlu1 %v1680_v32, %s1181_s21 }
 0x1cc   :  { %v847_v40 = vpop.permute.xlu0 %846 }
 0x1cd   :  { %v849_v38 = vpop.permute.xlu1 %848  ;;  %937 = vst.msk [vmem:[%s2388_s5 + $0x30] sm:$0xff] %vm930_vm3, %v847_v40 }
 0x1ce   :  { %938 = vst.msk [vmem:[%s2388_s5 + $0x38] sm:$0xff] %vm930_vm3, %v849_v38  ;;  %636 = vrot.lane.b32.xlu0 %v1703_v39, %s1181_s21 }
 0x1cf   :  { %638 = vrot.lane.b32.xlu1 %v1700_v36, %s1181_s21 }
 0x1d0   :  { %v879_v42 = vpop.permute.xlu0 %878 }
 0x1d1   :  { %v881_v41 = vpop.permute.xlu1 %880  ;;  %953 = vst.msk [vmem:[%s2388_s5 + $0xb0] sm:$0xff] %vm930_vm3, %v879_v42 }
 0x1d2   :  { %954 = vst.msk [vmem:[%s2388_s5 + $0xb8] sm:$0xff] %vm930_vm3, %v881_v41  ;;  %733 = vrot.lane.b32.xlu0 %v1683_v34, %s1182_s12 }
 0x1d3   :  { %735 = vrot.lane.b32.xlu1 %v1680_v32, %s1182_s12 }
 0x1d4   :  { %v464_v44 = vpop.permute.xlu0 %463 }
 0x1d5   :  { %v466_v43 = vpop.permute.xlu1 %465  ;;  %552 = vst.msk [vmem:[%s2387_s4 + $0x40] sm:$0xff] %vm543_vm2, %v464_v44 }
 0x1d6   :  { %553 = vst.msk [vmem:[%s2387_s4 + $0x48] sm:$0xff] %vm543_vm2, %v466_v43  ;;  %765 = vrot.lane.b32.xlu0 %v1703_v39, %s1182_s12 }
 0x1d7   :  { %767 = vrot.lane.b32.xlu1 %v1700_v36, %s1182_s12 }
 0x1d8   :  { %v496_v46 = vpop.permute.xlu0 %495 }
 0x1d9   :  { %v498_v45 = vpop.permute.xlu1 %497  ;;  %568 = vst.msk [vmem:[%s2387_s4 + $0xc0] sm:$0xff] %vm543_vm2, %v496_v46 }
 0x1da   :  { %569 = vst.msk [vmem:[%s2387_s4 + $0xc8] sm:$0xff] %vm543_vm2, %v498_v45  ;;  %862 = vrot.lane.b32.xlu0 %v1683_v34, %s1183_s29 }
 0x1db   :  { %864 = vrot.lane.b32.xlu1 %v1680_v32, %s1183_s29 }
 0x1dc   :  { %v593_v48 = vpop.permute.xlu0 %592 }
 0x1dd   :  { %v595_v47 = vpop.permute.xlu1 %594  ;;  %1016 = vst.msk [vmem:[%s2386_s3 + $0x140] sm:$0xff] %vm382_vm1, %v593_v48 }
 0x1de   :  { %1017 = vst.msk [vmem:[%s2386_s3 + $0x148] sm:$0xff] %vm382_vm1, %v595_v47  ;;  %894 = vrot.lane.b32.xlu0 %v1703_v39, %s1183_s29 }
 0x1df   :  { %896 = vrot.lane.b32.xlu1 %v1700_v36, %s1183_s29 }
 0x1e0   :  { %v625_v34 = vpop.permute.xlu0 %624 }
 0x1e1   :  { %v627_v32 = vpop.permute.xlu1 %626  ;;  %1032 = vst.msk [vmem:[%s2386_s3 + $0x1c0] sm:$0xff] %vm382_vm1, %v625_v34 }
 0x1e2   :  { %1033 = vst.msk [vmem:[%s2386_s3 + $0x1c8] sm:$0xff] %vm382_vm1, %v627_v32 }
 0x1e4   :  { %v722_v50 = vpop.permute.xlu0 %721 }
 0x1e5   :  { %v724_v49 = vpop.permute.xlu1 %723  ;;  %1048 = vst.msk [vmem:[%s2387_s4 + $0x140] sm:$0xff] %vm543_vm2, %v722_v50 }
 0x1e6   :  { %1049 = vst.msk [vmem:[%s2387_s4 + $0x148] sm:$0xff] %vm543_vm2, %v724_v49 }
 0x1e8   :  { %v754_v39 = vpop.permute.xlu0 %753 }
 0x1e9   :  { %v756_v36 = vpop.permute.xlu1 %755  ;;  %1064 = vst.msk [vmem:[%s2387_s4 + $0x1c0] sm:$0xff] %vm543_vm2, %v754_v39 }
 0x1ea   :  { %1065 = vst.msk [vmem:[%s2387_s4 + $0x1c8] sm:$0xff] %vm543_vm2, %v756_v36 }
 0x1ec   :  { %v851_v52 = vpop.permute.xlu0 %850 }
 0x1ed   :  { %v853_v51 = vpop.permute.xlu1 %852  ;;  %939 = vst.msk [vmem:[%s2388_s5 + $0x40] sm:$0xff] %vm930_vm3, %v851_v52 }
 0x1ee   :  { %940 = vst.msk [vmem:[%s2388_s5 + $0x48] sm:$0xff] %vm930_vm3, %v853_v51 }
 0x1f0   :  { %v883_v54 = vpop.permute.xlu0 %882 }
 0x1f1   :  { %v885_v53 = vpop.permute.xlu1 %884  ;;  %955 = vst.msk [vmem:[%s2388_s5 + $0xc0] sm:$0xff] %vm930_vm3, %v883_v54 }
 0x1f2   :  { %956 = vst.msk [vmem:[%s2388_s5 + $0xc8] sm:$0xff] %vm930_vm3, %v885_v53 }
 0x1f4   :  { %v468_v56 = vpop.permute.xlu0 %467 }
 0x1f5   :  { %v470_v55 = vpop.permute.xlu1 %469  ;;  %554 = vst.msk [vmem:[%s2387_s4 + $0x50] sm:$0xff] %vm543_vm2, %v468_v56 }
 0x1f6   :  { %555 = vst.msk [vmem:[%s2387_s4 + $0x58] sm:$0xff] %vm543_vm2, %v470_v55 }
 0x1f8   :  { %v500_v58 = vpop.permute.xlu0 %499 }
 0x1f9   :  { %v502_v57 = vpop.permute.xlu1 %501  ;;  %570 = vst.msk [vmem:[%s2387_s4 + $0xd0] sm:$0xff] %vm543_vm2, %v500_v58 }
 0x1fa   :  { %571 = vst.msk [vmem:[%s2387_s4 + $0xd8] sm:$0xff] %vm543_vm2, %v502_v57 }
 0x1fc   :  { %v597_v60 = vpop.permute.xlu0 %596 }
 0x1fd   :  { %v599_v59 = vpop.permute.xlu1 %598  ;;  %1018 = vst.msk [vmem:[%s2386_s3 + $0x150] sm:$0xff] %vm382_vm1, %v597_v60 }
 0x1fe   :  { %1019 = vst.msk [vmem:[%s2386_s3 + $0x158] sm:$0xff] %vm382_vm1, %v599_v59 }
 0x200   :  { %v629_v62 = vpop.permute.xlu0 %628 }
 0x201   :  { %v631_v61 = vpop.permute.xlu1 %630  ;;  %1034 = vst.msk [vmem:[%s2386_s3 + $0x1d0] sm:$0xff] %vm382_vm1, %v629_v62 }
 0x202   :  { %1035 = vst.msk [vmem:[%s2386_s3 + $0x1d8] sm:$0xff] %vm382_vm1, %v631_v61 }
 0x204   :  { %v726_v0 = vpop.permute.xlu0 %725 }
 0x205   :  { %v728_v63 = vpop.permute.xlu1 %727  ;;  %1050 = vst.msk [vmem:[%s2387_s4 + $0x150] sm:$0xff] %vm543_vm2, %v726_v0 }
 0x206   :  { %1051 = vst.msk [vmem:[%s2387_s4 + $0x158] sm:$0xff] %vm543_vm2, %v728_v63 }
 0x208   :  { %v758_v2 = vpop.permute.xlu0 %757 }
 0x209   :  { %v760_v1 = vpop.permute.xlu1 %759  ;;  %1066 = vst.msk [vmem:[%s2387_s4 + $0x1d0] sm:$0xff] %vm543_vm2, %v758_v2 }
 0x20a   :  { %1067 = vst.msk [vmem:[%s2387_s4 + $0x1d8] sm:$0xff] %vm543_vm2, %v760_v1 }
 0x20c   :  { %v855_v4 = vpop.permute.xlu0 %854 }
 0x20d   :  { %v857_v3 = vpop.permute.xlu1 %856  ;;  %941 = vst.msk [vmem:[%s2388_s5 + $0x50] sm:$0xff] %vm930_vm3, %v855_v4 }
 0x20e   :  { %942 = vst.msk [vmem:[%s2388_s5 + $0x58] sm:$0xff] %vm930_vm3, %v857_v3 }
 0x210   :  { %v887_v6 = vpop.permute.xlu0 %886 }
 0x211   :  { %v889_v5 = vpop.permute.xlu1 %888  ;;  %957 = vst.msk [vmem:[%s2388_s5 + $0xd0] sm:$0xff] %vm930_vm3, %v887_v6 }
 0x212   :  { %958 = vst.msk [vmem:[%s2388_s5 + $0xd8] sm:$0xff] %vm930_vm3, %v889_v5 }
 0x214   :  { %v472_v8 = vpop.permute.xlu0 %471 }
 0x215   :  { %v474_v7 = vpop.permute.xlu1 %473  ;;  %556 = vst.msk [vmem:[%s2387_s4 + $0x60] sm:$0xff] %vm543_vm2, %v472_v8 }
 0x216   :  { %557 = vst.msk [vmem:[%s2387_s4 + $0x68] sm:$0xff] %vm543_vm2, %v474_v7 }
 0x218   :  { %v504_v10 = vpop.permute.xlu0 %503 }
 0x219   :  { %v506_v9 = vpop.permute.xlu1 %505  ;;  %572 = vst.msk [vmem:[%s2387_s4 + $0xe0] sm:$0xff] %vm543_vm2, %v504_v10 }
 0x21a   :  { %573 = vst.msk [vmem:[%s2387_s4 + $0xe8] sm:$0xff] %vm543_vm2, %v506_v9 }
 0x21c   :  { %v601_v12 = vpop.permute.xlu0 %600 }
 0x21d   :  { %v603_v11 = vpop.permute.xlu1 %602  ;;  %1020 = vst.msk [vmem:[%s2386_s3 + $0x160] sm:$0xff] %vm382_vm1, %v601_v12 }
 0x21e   :  { %1021 = vst.msk [vmem:[%s2386_s3 + $0x168] sm:$0xff] %vm382_vm1, %v603_v11 }
 0x220   :  { %v633_v14 = vpop.permute.xlu0 %632 }
 0x221   :  { %v635_v13 = vpop.permute.xlu1 %634  ;;  %1036 = vst.msk [vmem:[%s2386_s3 + $0x1e0] sm:$0xff] %vm382_vm1, %v633_v14 }
 0x222   :  { %1037 = vst.msk [vmem:[%s2386_s3 + $0x1e8] sm:$0xff] %vm382_vm1, %v635_v13 }
 0x224   :  { %v730_v16 = vpop.permute.xlu0 %729 }
 0x225   :  { %v732_v15 = vpop.permute.xlu1 %731  ;;  %1052 = vst.msk [vmem:[%s2387_s4 + $0x160] sm:$0xff] %vm543_vm2, %v730_v16 }
 0x226   :  { %1053 = vst.msk [vmem:[%s2387_s4 + $0x168] sm:$0xff] %vm543_vm2, %v732_v15 }
 0x228   :  { %v762_v18 = vpop.permute.xlu0 %761 }
 0x229   :  { %v764_v17 = vpop.permute.xlu1 %763  ;;  %1068 = vst.msk [vmem:[%s2387_s4 + $0x1e0] sm:$0xff] %vm543_vm2, %v762_v18 }
 0x22a   :  { %1069 = vst.msk [vmem:[%s2387_s4 + $0x1e8] sm:$0xff] %vm543_vm2, %v764_v17 }
 0x22c   :  { %v859_v20 = vpop.permute.xlu0 %858 }
 0x22d   :  { %v861_v19 = vpop.permute.xlu1 %860  ;;  %943 = vst.msk [vmem:[%s2388_s5 + $0x60] sm:$0xff] %vm930_vm3, %v859_v20 }
 0x22e   :  { %944 = vst.msk [vmem:[%s2388_s5 + $0x68] sm:$0xff] %vm930_vm3, %v861_v19 }
 0x230   :  { %v891_v22 = vpop.permute.xlu0 %890 }
 0x231   :  { %v893_v21 = vpop.permute.xlu1 %892  ;;  %959 = vst.msk [vmem:[%s2388_s5 + $0xe0] sm:$0xff] %vm930_vm3, %v891_v22 }
 0x232   :  { %960 = vst.msk [vmem:[%s2388_s5 + $0xe8] sm:$0xff] %vm930_vm3, %v893_v21 }
 0x234   :  { %v476_v25 = vpop.permute.xlu0 %475 }
 0x235   :  { %v478_v23 = vpop.permute.xlu1 %477  ;;  %558 = vst.msk [vmem:[%s2387_s4 + $0x70] sm:$0xff] %vm543_vm2, %v476_v25 }
 0x236   :  { %559 = vst.msk [vmem:[%s2387_s4 + $0x78] sm:$0xff] %vm543_vm2, %v478_v23 }
 0x238   :  { %v508_v29 = vpop.permute.xlu0 %507 }
 0x239   :  { %v510_v27 = vpop.permute.xlu1 %509  ;;  %574 = vst.msk [vmem:[%s2387_s4 + $0xf0] sm:$0xff] %vm543_vm2, %v508_v29 }
 0x23a   :  { %575 = vst.msk [vmem:[%s2387_s4 + $0xf8] sm:$0xff] %vm543_vm2, %v510_v27 }
 0x23c   :  { %v605_v33 = vpop.permute.xlu0 %604 }
 0x23d   :  { %v607_v31 = vpop.permute.xlu1 %606  ;;  %1022 = vst.msk [vmem:[%s2386_s3 + $0x170] sm:$0xff] %vm382_vm1, %v605_v33 }
 0x23e   :  { %1023 = vst.msk [vmem:[%s2386_s3 + $0x178] sm:$0xff] %vm382_vm1, %v607_v31 }
 0x240   :  { %v637_v26 = vpop.permute.xlu0 %636 }
 0x241   :  { %v639_v24 = vpop.permute.xlu1 %638  ;;  %1038 = vst.msk [vmem:[%s2386_s3 + $0x1f0] sm:$0xff] %vm382_vm1, %v637_v26 }
 0x242   :  { %1039 = vst.msk [vmem:[%s2386_s3 + $0x1f8] sm:$0xff] %vm382_vm1, %v639_v24 }
 0x244   :  { %v734_v30 = vpop.permute.xlu0 %733 }
 0x245   :  { %v736_v28 = vpop.permute.xlu1 %735  ;;  %1054 = vst.msk [vmem:[%s2387_s4 + $0x170] sm:$0xff] %vm543_vm2, %v734_v30 }
 0x246   :  { %1055 = vst.msk [vmem:[%s2387_s4 + $0x178] sm:$0xff] %vm543_vm2, %v736_v28 }
 0x248   :  { %v766_v37 = vpop.permute.xlu0 %765 }
 0x249   :  { %v768_v35 = vpop.permute.xlu1 %767  ;;  %1070 = vst.msk [vmem:[%s2387_s4 + $0x1f0] sm:$0xff] %vm543_vm2, %v766_v37 }
 0x24a   :  { %1071 = vst.msk [vmem:[%s2387_s4 + $0x1f8] sm:$0xff] %vm543_vm2, %v768_v35 }
 0x24c   :  { %v863_v40 = vpop.permute.xlu0 %862 }
 0x24d   :  { %v865_v38 = vpop.permute.xlu1 %864  ;;  %945 = vst.msk [vmem:[%s2388_s5 + $0x70] sm:$0xff] %vm930_vm3, %v863_v40 }
 0x24e   :  { %946 = vst.msk [vmem:[%s2388_s5 + $0x78] sm:$0xff] %vm930_vm3, %v865_v38 }
 0x250   :  { %v895_v42 = vpop.permute.xlu0 %894 }
 0x251   :  { %v897_v41 = vpop.permute.xlu1 %896  ;;  %961 = vst.msk [vmem:[%s2388_s5 + $0xf0] sm:$0xff] %vm930_vm3, %v895_v42 }
 0x252   :  { %962 = vst.msk [vmem:[%s2388_s5 + $0xf8] sm:$0xff] %vm930_vm3, %v897_v41 }

</bundles_post_ra>
